<compile_context>
chip_gen: v7x
topology: tpu7x:2x2x1
jax: 0.10.0
libtpu: 0.0.40
codegen_flags: <defaults>
</compile_context>

<pallas_src>
import math
import jax
import jax.numpy as jnp
from jax import lax
from jax.experimental import pallas as pl
from jax.experimental.pallas import tpu as pltpu


def attn_pool_kernel(x_ref, bias_ref, w1_ref, b1_ref, g_ref, beta_ref,
                     w2_ref, b2_ref, o_ref):
    """One (Bt, S, D) batch slab per grid step.

    x_ref   : (Bt, S, D)  hidden states, bfloat16
    bias_ref: (Bt, S, 1)  additive mask bias, f32 (0 where valid, -1e30 where masked)
    w1_ref  : (D, D)      first Linear weight, transposed for x @ W, bfloat16
    b1_ref  : (1, D)      first Linear bias, f32
    g_ref   : (1, D)      LayerNorm gamma, f32
    beta_ref: (1, D)      LayerNorm beta, f32
    w2_ref  : (1, D)      second Linear weight (row vector), f32
    b2_ref  : (1, 1)      second Linear bias (SMEM scalar), f32
    o_ref   : (Bt, 1, D)  pooled output, f32
    """
    bt, s, d = x_ref.shape
    x = x_ref[...]                                   # (Bt, S, D) bf16
    x2 = x.reshape(bt * s, d)                        # (Bt*S, D)  (S padded to 16)

    # --- Linear(D, D): bf16 MXU matmul, f32 accumulation ---
    h = jnp.dot(x2, w1_ref[...], preferred_element_type=jnp.float32)  # (Bt*S, D)
    h = h + b1_ref[...]

    # --- LayerNorm over last dim (eps = 1e-5), single-pass stats, f32 math ---
    mu = jnp.mean(h, axis=-1, keepdims=True)
    ms = jnp.mean(h * h, axis=-1, keepdims=True)
    var = jnp.maximum(ms - mu * mu, 0.0)
    hn = (h - mu) * lax.rsqrt(var + 1e-5)
    hn = hn * g_ref[...] + beta_ref[...]

    # --- GELU (exact / erf form, PyTorch default) ---
    gelu = 0.5 * hn * (1.0 + lax.erf(hn * (1.0 / math.sqrt(2.0))))

    # --- Linear(D, 1): logits, plus additive mask bias ---
    logits = jnp.sum(gelu * w2_ref[...], axis=-1, keepdims=True) + b2_ref[0, 0]
    logits = logits.reshape(bt, s, 1) + bias_ref[...]            # (Bt, S, 1)

    # --- softmax over the sequence axis ---
    mx = jnp.max(logits, axis=1, keepdims=True)
    e = jnp.exp(logits - mx)
    denom = jnp.sum(e, axis=1, keepdims=True)
    w = e * pl.reciprocal(denom, approx=True)                    # (Bt, S, 1) f32

    # --- weighted sum as a batched (1, S) @ (S, D) MXU contraction ---
    pooled = lax.dot_general(
        w.astype(x.dtype), x,
        dimension_numbers=(((1,), (1,)), ((0,), (0,))),
        preferred_element_type=jnp.float32)                      # (Bt, 1, D)
    o_ref[...] = pooled.astype(o_ref.dtype)


def attention_pooling(last_hidden_state, attention_mask, params, *, bt=None):
    """params = (w1, b1, gamma, beta, w2, b2) mimicking the torch module."""
    B, S, D = last_hidden_state.shape
    w1, b1, gamma, beta, w2, b2 = params

    # Pad the sequence to a multiple of 16 (bf16 sublane packing). Padded
    # positions are masked out via the additive bias, so results are unchanged.
    S_pad = max(16, ((S + 15) // 16) * 16)

    # Pack Bt batch rows per grid step (keeps the MXU fed, amortizes step
    # overhead); cap the per-buffer x footprint at ~4 MiB.
    if bt is None:
        budget = 4 * 1024 * 1024
        bt = max(1, min(B, budget // max(S_pad * D * 2, 1), 8))
    B_pad = ((B + bt - 1) // bt) * bt

    # bf16 stream for the dominant operands (no-op if the model is already bf16).
    x = last_hidden_state.astype(jnp.bfloat16)
    mask = attention_mask.astype(jnp.float32)
    if S_pad != S or B_pad != B:
        x = jnp.pad(x, ((0, B_pad - B), (0, S_pad - S), (0, 0)))
        mask = jnp.pad(mask, ((0, B_pad - B), (0, S_pad - S)))
    bias = ((mask - 1.0) * 1e30).reshape(B_pad, S_pad, 1)        # additive mask bias

    # Torch Linear computes x @ W.T + b, with weight shape (out, in).
    w1_t = jnp.transpose(w1).astype(jnp.bfloat16)                # (D, D)
    b1_r = b1.reshape(1, D).astype(jnp.float32)
    g_r = gamma.reshape(1, D).astype(jnp.float32)
    beta_r = beta.reshape(1, D).astype(jnp.float32)
    w2_r = w2.reshape(1, D).astype(jnp.float32)
    b2_s = b2.reshape(1, 1).astype(jnp.float32)                  # scalar in SMEM

    # Explicit VMEM budget (x/bias/out double-buffered, W1 single-buffered).
    vmem_need = (2 * bt * S_pad * D * 2        # x blocks (bf16)
                 + 2 * bt * S_pad * 4          # bias blocks
                 + 2 * bt * D * 4              # output blocks
                 + D * D * 2                   # W1^T (single-buffered)
                 + 8 * D * 4)                  # small parameter rows
    vmem_limit = int(min(96 * 2 ** 20, max(32 * 2 ** 20, 2 * vmem_need)))

    def build(single_buffer_consts):
        const_kw = {}
        if single_buffer_consts:
            const_kw = dict(pipeline_mode=pl.Buffered(buffer_count=1))
        in_specs = [
            pl.BlockSpec((bt, S_pad, D), lambda b: (b, 0, 0)),          # hidden states
            pl.BlockSpec((bt, S_pad, 1), lambda b: (b, 0, 0)),          # mask bias
            pl.BlockSpec((D, D), lambda b: (0, 0), **const_kw),         # W1^T
            pl.BlockSpec((1, D), lambda b: (0, 0), **const_kw),         # b1
            pl.BlockSpec((1, D), lambda b: (0, 0), **const_kw),         # gamma
            pl.BlockSpec((1, D), lambda b: (0, 0), **const_kw),         # beta
            pl.BlockSpec((1, D), lambda b: (0, 0), **const_kw),         # w2 row
            pl.BlockSpec(memory_space=pltpu.MemorySpace.SMEM),          # b2 scalar
        ]
        return pl.pallas_call(
            attn_pool_kernel,
            out_shape=jax.ShapeDtypeStruct((B_pad, 1, D), jnp.float32),
            grid_spec=pltpu.PrefetchScalarGridSpec(
                num_scalar_prefetch=0,
                grid=(B_pad // bt,),
                in_specs=in_specs,
                out_specs=pl.BlockSpec((bt, 1, D), lambda b: (b, 0, 0)),
            ),
            compiler_params=pltpu.CompilerParams(
                dimension_semantics=("parallel",),
                vmem_limit_bytes=vmem_limit),
        )

    args = (x, bias, w1_t, b1_r, g_r, beta_r, w2_r, b2_s)
    try:
        out = jax.block_until_ready(build(True)(*args))
    except Exception:
        # Fallback if pipeline_mode=pl.Buffered(1) is not supported by this
        # JAX/Mosaic build; identical semantics, default double-buffering.
        out = jax.block_until_ready(build(False)(*args))

    return out.reshape(B_pad, D)[:B]


def init_params(key, D):
    """Deterministic init mirroring the torch module's parameter shapes."""
    k1, k2, k3, k4 = jax.random.split(key, 4)
    bound1 = 1.0 / math.sqrt(D)
    w1 = jax.random.uniform(k1, (D, D), jnp.float32, -bound1, bound1)   # Linear(D,D).weight
    b1 = jax.random.uniform(k2, (D,), jnp.float32, -bound1, bound1)
    gamma = jnp.ones((D,), jnp.float32)                                 # LayerNorm
    beta = jnp.zeros((D,), jnp.float32)
    w2 = jax.random.uniform(k3, (1, D), jnp.float32, -bound1, bound1)   # Linear(D,1).weight
    b2 = jax.random.uniform(k4, (1,), jnp.float32, -bound1, bound1)
    return (w1, b1, gamma, beta, w2, b2)


def reference(last_hidden_state, attention_mask, params):
    """Pure-JAX f32 reference matching the PyTorch forward semantics."""
    w1, b1, gamma, beta, w2, b2 = params
    x = last_hidden_state.astype(jnp.float32)
    h = x @ w1.T + b1
    mu = jnp.mean(h, axis=-1, keepdims=True)
    var = jnp.mean((h - mu) ** 2, axis=-1, keepdims=True)
    h = (h - mu) / jnp.sqrt(var + 1e-5) * gamma + beta
    h = jax.nn.gelu(h, approximate=False)
    logits = h @ w2.T + b2                                   # (B, S, 1)
    logits = jnp.where(attention_mask[..., None] == 0, -jnp.inf, logits)
    w = jax.nn.softmax(logits, axis=1)
    return jnp.sum(w * x, axis=1)


if __name__ == "__main__":
    B, S, D = 2, 8, 128
    key = jax.random.PRNGKey(0)
    kx, km, kp = jax.random.split(key, 3)

    last_hidden_state = jax.random.normal(kx, (B, S, D), jnp.float32)
    attention_mask = (jax.random.uniform(km, (B, S)) > 0.3).astype(jnp.int32)
    # Ensure every row has at least one valid token (avoid all-masked softmax).
    attention_mask = attention_mask.at[:, 0].set(1)

    params = init_params(kp, D)

    out = attention_pooling(last_hidden_state, attention_mask, params)
    out = jax.block_until_ready(out)

    ref = reference(last_hidden_state, attention_mask, params)
    assert out.shape == (B, D)
    # bf16 operands for the MXU path => slightly looser tolerance than pure f32.
    assert jnp.allclose(out, ref, atol=3e-2, rtol=3e-2), (
        jnp.max(jnp.abs(out - ref)), out, ref)

    print("KERNEL_OK")
</pallas_src>

<mosaic_0001>
module attributes {stable_mosaic.version = 11 : i64} {
  func.func @attn_pool_kernel(%arg0: i32, %arg1: memref<2x16x128xbf16, #tpu.memory_space<vmem>>, %arg2: memref<2x16x1xf32, #tpu.memory_space<vmem>>, %arg3: memref<128x128xbf16, #tpu.memory_space<vmem>>, %arg4: memref<1x128xf32, #tpu.memory_space<vmem>>, %arg5: memref<1x128xf32, #tpu.memory_space<vmem>>, %arg6: memref<1x128xf32, #tpu.memory_space<vmem>>, %arg7: memref<1x128xf32, #tpu.memory_space<vmem>>, %arg8: memref<1x1xf32, #tpu.memory_space<smem>>, %arg9: memref<2x1x128xf32, #tpu.memory_space<vmem>>) attributes {dimension_semantics = [#tpu.dimension_semantics<parallel>], iteration_bounds = array<i64: 1>, scalar_prefetch = 0 : i64, scratch_operands = 0 : i64, tpu.core_type = #tpu.core_type<tc>, window_params = [{transform_indices = @transform_0, window_bounds = array<i64: 2, 16, 128>}, {transform_indices = @transform_1, window_bounds = array<i64: 2, 16, 1>}, {pipeline_mode = #tpu.pipeline_mode<synchronous>, transform_indices = @transform_2, window_bounds = array<i64: 128, 128>}, {pipeline_mode = #tpu.pipeline_mode<synchronous>, transform_indices = @transform_3, window_bounds = array<i64: 1, 128>}, {pipeline_mode = #tpu.pipeline_mode<synchronous>, transform_indices = @transform_4, window_bounds = array<i64: 1, 128>}, {pipeline_mode = #tpu.pipeline_mode<synchronous>, transform_indices = @transform_5, window_bounds = array<i64: 1, 128>}, {pipeline_mode = #tpu.pipeline_mode<synchronous>, transform_indices = @transform_6, window_bounds = array<i64: 1, 128>}, {transform_indices = @transform_7, window_bounds = array<i64: 1, 1>}, {transform_indices = @transform_8, window_bounds = array<i64: 2, 1, 128>}]} {
    %c0 = arith.constant 0 : index
    %c0_0 = arith.constant 0 : index
    %c0_1 = arith.constant 0 : index
    %0 = vector.load %arg1[%c0, %c0_0, %c0_1] : memref<2x16x128xbf16, #tpu.memory_space<vmem>>, vector<2x16x128xbf16>
    %1 = vector.shape_cast %0 : vector<2x16x128xbf16> to vector<32x128xbf16>
    %c0_2 = arith.constant 0 : index
    %c0_3 = arith.constant 0 : index
    %2 = vector.load %arg3[%c0_2, %c0_3] : memref<128x128xbf16, #tpu.memory_space<vmem>>, vector<128x128xbf16>
    %cst = arith.constant dense<0.000000e+00> : vector<32x128xf32>
    %3 = tpu.matmul %1, %2, %cst {dimension_numbers = #tpu.dot_dimension_numbers<[1], [0], [0], [1], [0, 0, 1, 1], [], []>} : vector<32x128xbf16>, vector<128x128xbf16>, vector<32x128xf32> -> vector<32x128xf32>
    %c0_4 = arith.constant 0 : index
    %c0_5 = arith.constant 0 : index
    %4 = vector.load %arg4[%c0_4, %c0_5] : memref<1x128xf32, #tpu.memory_space<vmem>>, vector<1x128xf32>
    %5 = vector.broadcast %4 : vector<1x128xf32> to vector<32x128xf32>
    %6 = arith.addf %3, %5 : vector<32x128xf32>
    %cst_6 = arith.constant dense<0.000000e+00> : vector<32xf32>
    %7 = vector.multi_reduction <add>, %6, %cst_6 [1] : vector<32x128xf32> to vector<32xf32>
    %8 = vector.shape_cast %7 : vector<32xf32> to vector<32x1xf32>
    %cst_7 = arith.constant 1.280000e+02 : f32
    %9 = vector.broadcast %cst_7 : f32 to vector<32x1xf32>
    %10 = arith.divf %8, %9 : vector<32x1xf32>
    %11 = arith.mulf %6, %6 : vector<32x128xf32>
    %cst_8 = arith.constant dense<0.000000e+00> : vector<32xf32>
    %12 = vector.multi_reduction <add>, %11, %cst_8 [1] : vector<32x128xf32> to vector<32xf32>
    %13 = vector.shape_cast %12 : vector<32xf32> to vector<32x1xf32>
    %cst_9 = arith.constant 1.280000e+02 : f32
    %14 = vector.broadcast %cst_9 : f32 to vector<32x1xf32>
    %15 = arith.divf %13, %14 : vector<32x1xf32>
    %16 = arith.mulf %10, %10 : vector<32x1xf32>
    %17 = arith.subf %15, %16 : vector<32x1xf32>
    %cst_10 = arith.constant 0.000000e+00 : f32
    %18 = vector.broadcast %cst_10 : f32 to vector<32x1xf32>
    %19 = arith.maximumf %17, %18 : vector<32x1xf32>
    %20 = vector.broadcast %10 : vector<32x1xf32> to vector<32x128xf32>
    %21 = arith.subf %6, %20 : vector<32x128xf32>
    %cst_11 = arith.constant 9.99999974E-6 : f32
    %22 = vector.broadcast %cst_11 : f32 to vector<32x1xf32>
    %23 = arith.addf %19, %22 : vector<32x1xf32>
    %24 = math.rsqrt %23 : vector<32x1xf32>
    %25 = vector.broadcast %24 : vector<32x1xf32> to vector<32x128xf32>
    %26 = arith.mulf %21, %25 : vector<32x128xf32>
    %c0_12 = arith.constant 0 : index
    %c0_13 = arith.constant 0 : index
    %27 = vector.load %arg5[%c0_12, %c0_13] : memref<1x128xf32, #tpu.memory_space<vmem>>, vector<1x128xf32>
    %28 = vector.broadcast %27 : vector<1x128xf32> to vector<32x128xf32>
    %29 = arith.mulf %26, %28 : vector<32x128xf32>
    %c0_14 = arith.constant 0 : index
    %c0_15 = arith.constant 0 : index
    %30 = vector.load %arg6[%c0_14, %c0_15] : memref<1x128xf32, #tpu.memory_space<vmem>>, vector<1x128xf32>
    %31 = vector.broadcast %30 : vector<1x128xf32> to vector<32x128xf32>
    %32 = arith.addf %29, %31 : vector<32x128xf32>
    %cst_16 = arith.constant 5.000000e-01 : f32
    %33 = vector.broadcast %cst_16 : f32 to vector<32x128xf32>
    %34 = arith.mulf %33, %32 : vector<32x128xf32>
    %cst_17 = arith.constant 0.707106769 : f32
    %35 = vector.broadcast %cst_17 : f32 to vector<32x128xf32>
    %36 = arith.mulf %32, %35 : vector<32x128xf32>
    %37 = math.erf %36 : vector<32x128xf32>
    %cst_18 = arith.constant 1.000000e+00 : f32
    %38 = vector.broadcast %cst_18 : f32 to vector<32x128xf32>
    %39 = arith.addf %38, %37 : vector<32x128xf32>
    %40 = arith.mulf %34, %39 : vector<32x128xf32>
    %c0_19 = arith.constant 0 : index
    %c0_20 = arith.constant 0 : index
    %41 = vector.load %arg7[%c0_19, %c0_20] : memref<1x128xf32, #tpu.memory_space<vmem>>, vector<1x128xf32>
    %42 = vector.broadcast %41 : vector<1x128xf32> to vector<32x128xf32>
    %43 = arith.mulf %40, %42 : vector<32x128xf32>
    %cst_21 = arith.constant dense<0.000000e+00> : vector<32xf32>
    %44 = vector.multi_reduction <add>, %43, %cst_21 [1] : vector<32x128xf32> to vector<32xf32>
    %45 = vector.shape_cast %44 : vector<32xf32> to vector<32x1xf32>
    %c0_22 = arith.constant 0 : index
    %c0_23 = arith.constant 0 : index
    %46 = memref.load %arg8[%c0_22, %c0_23] : memref<1x1xf32, #tpu.memory_space<smem>>
    %47 = vector.broadcast %46 : f32 to vector<32x1xf32>
    %48 = arith.addf %45, %47 : vector<32x1xf32>
    %49 = vector.shape_cast %48 : vector<32x1xf32> to vector<2x16x1xf32>
    %c0_24 = arith.constant 0 : index
    %c0_25 = arith.constant 0 : index
    %c0_26 = arith.constant 0 : index
    %50 = vector.load %arg2[%c0_24, %c0_25, %c0_26] : memref<2x16x1xf32, #tpu.memory_space<vmem>>, vector<2x16x1xf32>
    %51 = arith.addf %49, %50 : vector<2x16x1xf32>
    %cst_27 = arith.constant dense<0xFF800000> : vector<2x1xf32>
    %52 = vector.multi_reduction <maximumf>, %51, %cst_27 [1] : vector<2x16x1xf32> to vector<2x1xf32>
    %53 = vector.shape_cast %52 : vector<2x1xf32> to vector<2x1x1xf32>
    %54 = vector.broadcast %53 : vector<2x1x1xf32> to vector<2x16x1xf32>
    %55 = arith.subf %51, %54 : vector<2x16x1xf32>
    %56 = math.exp %55 : vector<2x16x1xf32>
    %cst_28 = arith.constant dense<0.000000e+00> : vector<2x1xf32>
    %57 = vector.multi_reduction <add>, %56, %cst_28 [1] : vector<2x16x1xf32> to vector<2x1xf32>
    %58 = vector.shape_cast %57 : vector<2x1xf32> to vector<2x1x1xf32>
    %59 = tpu.reciprocal %58 {approx = true} : vector<2x1x1xf32> -> vector<2x1x1xf32>
    %60 = vector.broadcast %59 : vector<2x1x1xf32> to vector<2x16x1xf32>
    %61 = arith.mulf %56, %60 : vector<2x16x1xf32>
    %62 = arith.truncf %61 : vector<2x16x1xf32> to vector<2x16x1xbf16>
    %cst_29 = arith.constant dense<0.000000e+00> : vector<2x1x128xf32>
    %63 = tpu.matmul %62, %0, %cst_29 {dimension_numbers = #tpu.dot_dimension_numbers<[1], [1], [2], [2], [0, 0, 0, 2, 1, 2], [0], [0]>} : vector<2x16x1xbf16>, vector<2x16x128xbf16>, vector<2x1x128xf32> -> vector<2x1x128xf32>
    %c0_30 = arith.constant 0 : index
    %c0_31 = arith.constant 0 : index
    %c0_32 = arith.constant 0 : index
    %64 = vector.load %arg9[%c0_30, %c0_31, %c0_32] : memref<2x1x128xf32, #tpu.memory_space<vmem>>, vector<2x1x128xf32>
    tpu.vector_store %arg9[%c0_30, %c0_31, %c0_32], %63 {strides = array<i32>} : memref<2x1x128xf32, #tpu.memory_space<vmem>>, vector<2x1x128xf32>,
    return
  }
  func.func @transform_0(%arg0: i32) -> (i32, i32, i32) {
    %c0_i32 = arith.constant 0 : i32
    %c0_i32_0 = arith.constant 0 : i32
    %c0_i32_1 = arith.constant 0 : i32
    return %arg0, %c0_i32, %c0_i32_0 : i32, i32, i32
  }
  func.func @transform_1(%arg0: i32) -> (i32, i32, i32) {
    %c0_i32 = arith.constant 0 : i32
    %c0_i32_0 = arith.constant 0 : i32
    %c0_i32_1 = arith.constant 0 : i32
    return %arg0, %c0_i32, %c0_i32_0 : i32, i32, i32
  }
  func.func @transform_2(%arg0: i32) -> (i32, i32) {
    %c0_i32 = arith.constant 0 : i32
    %c0_i32_0 = arith.constant 0 : i32
    %c0_i32_1 = arith.constant 0 : i32
    return %c0_i32, %c0_i32_0 : i32, i32
  }
  func.func @transform_3(%arg0: i32) -> (i32, i32) {
    %c0_i32 = arith.constant 0 : i32
    %c0_i32_0 = arith.constant 0 : i32
    %c0_i32_1 = arith.constant 0 : i32
    return %c0_i32, %c0_i32_0 : i32, i32
  }
  func.func @transform_4(%arg0: i32) -> (i32, i32) {
    %c0_i32 = arith.constant 0 : i32
    %c0_i32_0 = arith.constant 0 : i32
    %c0_i32_1 = arith.constant 0 : i32
    return %c0_i32, %c0_i32_0 : i32, i32
  }
  func.func @transform_5(%arg0: i32) -> (i32, i32) {
    %c0_i32 = arith.constant 0 : i32
    %c0_i32_0 = arith.constant 0 : i32
    %c0_i32_1 = arith.constant 0 : i32
    return %c0_i32, %c0_i32_0 : i32, i32
  }
  func.func @transform_6(%arg0: i32) -> (i32, i32) {
    %c0_i32 = arith.constant 0 : i32
    %c0_i32_0 = arith.constant 0 : i32
    %c0_i32_1 = arith.constant 0 : i32
    return %c0_i32, %c0_i32_0 : i32, i32
  }
  func.func @transform_7(%arg0: i32) -> (i32, i32) {
    %c0_i32 = arith.constant 0 : i32
    %c0_i32_0 = arith.constant 0 : i32
    %c0_i32_1 = arith.constant 0 : i32
    return %c0_i32, %c0_i32_0 : i32, i32
  }
  func.func @transform_8(%arg0: i32) -> (i32, i32, i32) {
    %c0_i32 = arith.constant 0 : i32
    %c0_i32_0 = arith.constant 0 : i32
    %c0_i32_1 = arith.constant 0 : i32
    return %arg0, %c0_i32, %c0_i32_0 : i32, i32, i32
  }
}

module attributes {stable_mosaic.version = 11 : i64} {
  func.func @attn_pool_kernel(%arg0: i32, %arg1: memref<2x16x128xbf16, #tpu.memory_space<vmem>>, %arg2: memref<2x16x1xf32, #tpu.memory_space<vmem>>, %arg3: memref<128x128xbf16, #tpu.memory_space<vmem>>, %arg4: memref<1x128xf32, #tpu.memory_space<vmem>>, %arg5: memref<1x128xf32, #tpu.memory_space<vmem>>, %arg6: memref<1x128xf32, #tpu.memory_space<vmem>>, %arg7: memref<1x128xf32, #tpu.memory_space<vmem>>, %arg8: memref<1x1xf32, #tpu.memory_space<smem>>, %arg9: memref<2x1x128xf32, #tpu.memory_space<vmem>>) attributes {dimension_semantics = [#tpu.dimension_semantics<parallel>], iteration_bounds = array<i64: 1>, scalar_prefetch = 0 : i64, scratch_operands = 0 : i64, tpu.core_type = #tpu.core_type<tc>, window_params = [{transform_indices = @transform_0, window_bounds = array<i64: 2, 16, 128>}, {transform_indices = @transform_1, window_bounds = array<i64: 2, 16, 1>}, {pipeline_mode = #tpu.pipeline_mode<synchronous>, transform_indices = @transform_2, window_bounds = array<i64: 128, 128>}, {pipeline_mode = #tpu.pipeline_mode<synchronous>, transform_indices = @transform_3, window_bounds = array<i64: 1, 128>}, {pipeline_mode = #tpu.pipeline_mode<synchronous>, transform_indices = @transform_4, window_bounds = array<i64: 1, 128>}, {pipeline_mode = #tpu.pipeline_mode<synchronous>, transform_indices = @transform_5, window_bounds = array<i64: 1, 128>}, {pipeline_mode = #tpu.pipeline_mode<synchronous>, transform_indices = @transform_6, window_bounds = array<i64: 1, 128>}, {transform_indices = @transform_7, window_bounds = array<i64: 1, 1>}, {transform_indices = @transform_8, window_bounds = array<i64: 2, 1, 128>}]} {
    %c0 = arith.constant 0 : index
    %c0_0 = arith.constant 0 : index
    %c0_1 = arith.constant 0 : index
    %0 = vector.load %arg1[%c0, %c0_0, %c0_1] : memref<2x16x128xbf16, #tpu.memory_space<vmem>>, vector<2x16x128xbf16>
    %1 = vector.shape_cast %0 : vector<2x16x128xbf16> to vector<32x128xbf16>
    %c0_2 = arith.constant 0 : index
    %c0_3 = arith.constant 0 : index
    %2 = vector.load %arg3[%c0_2, %c0_3] : memref<128x128xbf16, #tpu.memory_space<vmem>>, vector<128x128xbf16>
    %cst = arith.constant dense<0.000000e+00> : vector<32x128xf32>
    %3 = tpu.matmul %1, %2, %cst {dimension_numbers = #tpu.dot_dimension_numbers<[1], [0], [0], [1], [0, 0, 1, 1], [], []>} : vector<32x128xbf16>, vector<128x128xbf16>, vector<32x128xf32> -> vector<32x128xf32>
    %c0_4 = arith.constant 0 : index
    %c0_5 = arith.constant 0 : index
    %4 = vector.load %arg4[%c0_4, %c0_5] : memref<1x128xf32, #tpu.memory_space<vmem>>, vector<1x128xf32>
    %5 = vector.broadcast %4 : vector<1x128xf32> to vector<32x128xf32>
    %6 = arith.addf %3, %5 : vector<32x128xf32>
    %cst_6 = arith.constant dense<0.000000e+00> : vector<32xf32>
    %7 = vector.multi_reduction <add>, %6, %cst_6 [1] : vector<32x128xf32> to vector<32xf32>
    %8 = vector.shape_cast %7 : vector<32xf32> to vector<32x1xf32>
    %cst_7 = arith.constant 1.280000e+02 : f32
    %9 = vector.broadcast %cst_7 : f32 to vector<32x1xf32>
    %10 = arith.divf %8, %9 : vector<32x1xf32>
    %11 = arith.mulf %6, %6 : vector<32x128xf32>
    %cst_8 = arith.constant dense<0.000000e+00> : vector<32xf32>
    %12 = vector.multi_reduction <add>, %11, %cst_8 [1] : vector<32x128xf32> to vector<32xf32>
    %13 = vector.shape_cast %12 : vector<32xf32> to vector<32x1xf32>
    %cst_9 = arith.constant 1.280000e+02 : f32
    %14 = vector.broadcast %cst_9 : f32 to vector<32x1xf32>
    %15 = arith.divf %13, %14 : vector<32x1xf32>
    %16 = arith.mulf %10, %10 : vector<32x1xf32>
    %17 = arith.subf %15, %16 : vector<32x1xf32>
    %cst_10 = arith.constant 0.000000e+00 : f32
    %18 = vector.broadcast %cst_10 : f32 to vector<32x1xf32>
    %19 = arith.maximumf %17, %18 : vector<32x1xf32>
    %20 = vector.broadcast %10 : vector<32x1xf32> to vector<32x128xf32>
    %21 = arith.subf %6, %20 : vector<32x128xf32>
    %cst_11 = arith.constant 9.99999974E-6 : f32
    %22 = vector.broadcast %cst_11 : f32 to vector<32x1xf32>
    %23 = arith.addf %19, %22 : vector<32x1xf32>
    %24 = math.rsqrt %23 : vector<32x1xf32>
    %25 = vector.broadcast %24 : vector<32x1xf32> to vector<32x128xf32>
    %26 = arith.mulf %21, %25 : vector<32x128xf32>
    %c0_12 = arith.constant 0 : index
    %c0_13 = arith.constant 0 : index
    %27 = vector.load %arg5[%c0_12, %c0_13] : memref<1x128xf32, #tpu.memory_space<vmem>>, vector<1x128xf32>
    %28 = vector.broadcast %27 : vector<1x128xf32> to vector<32x128xf32>
    %29 = arith.mulf %26, %28 : vector<32x128xf32>
    %c0_14 = arith.constant 0 : index
    %c0_15 = arith.constant 0 : index
    %30 = vector.load %arg6[%c0_14, %c0_15] : memref<1x128xf32, #tpu.memory_space<vmem>>, vector<1x128xf32>
    %31 = vector.broadcast %30 : vector<1x128xf32> to vector<32x128xf32>
    %32 = arith.addf %29, %31 : vector<32x128xf32>
    %cst_16 = arith.constant 5.000000e-01 : f32
    %33 = vector.broadcast %cst_16 : f32 to vector<32x128xf32>
    %34 = arith.mulf %33, %32 : vector<32x128xf32>
    %cst_17 = arith.constant 0.707106769 : f32
    %35 = vector.broadcast %cst_17 : f32 to vector<32x128xf32>
    %36 = arith.mulf %32, %35 : vector<32x128xf32>
    %37 = math.erf %36 : vector<32x128xf32>
    %cst_18 = arith.constant 1.000000e+00 : f32
    %38 = vector.broadcast %cst_18 : f32 to vector<32x128xf32>
    %39 = arith.addf %38, %37 : vector<32x128xf32>
    %40 = arith.mulf %34, %39 : vector<32x128xf32>
    %c0_19 = arith.constant 0 : index
    %c0_20 = arith.constant 0 : index
    %41 = vector.load %arg7[%c0_19, %c0_20] : memref<1x128xf32, #tpu.memory_space<vmem>>, vector<1x128xf32>
    %42 = vector.broadcast %41 : vector<1x128xf32> to vector<32x128xf32>
    %43 = arith.mulf %40, %42 : vector<32x128xf32>
    %cst_21 = arith.constant dense<0.000000e+00> : vector<32xf32>
    %44 = vector.multi_reduction <add>, %43, %cst_21 [1] : vector<32x128xf32> to vector<32xf32>
    %45 = vector.shape_cast %44 : vector<32xf32> to vector<32x1xf32>
    %c0_22 = arith.constant 0 : index
    %c0_23 = arith.constant 0 : index
    %46 = memref.load %arg8[%c0_22, %c0_23] : memref<1x1xf32, #tpu.memory_space<smem>>
    %47 = vector.broadcast %46 : f32 to vector<32x1xf32>
    %48 = arith.addf %45, %47 : vector<32x1xf32>
    %49 = vector.shape_cast %48 : vector<32x1xf32> to vector<2x16x1xf32>
    %c0_24 = arith.constant 0 : index
    %c0_25 = arith.constant 0 : index
    %c0_26 = arith.constant 0 : index
    %50 = vector.load %arg2[%c0_24, %c0_25, %c0_26] : memref<2x16x1xf32, #tpu.memory_space<vmem>>, vector<2x16x1xf32>
    %51 = arith.addf %49, %50 : vector<2x16x1xf32>
    %cst_27 = arith.constant dense<0xFF800000> : vector<2x1xf32>
    %52 = vector.multi_reduction <maximumf>, %51, %cst_27 [1] : vector<2x16x1xf32> to vector<2x1xf32>
    %53 = vector.shape_cast %52 : vector<2x1xf32> to vector<2x1x1xf32>
    %54 = vector.broadcast %53 : vector<2x1x1xf32> to vector<2x16x1xf32>
    %55 = arith.subf %51, %54 : vector<2x16x1xf32>
    %56 = math.exp %55 : vector<2x16x1xf32>
    %cst_28 = arith.constant dense<0.000000e+00> : vector<2x1xf32>
    %57 = vector.multi_reduction <add>, %56, %cst_28 [1] : vector<2x16x1xf32> to vector<2x1xf32>
    %58 = vector.shape_cast %57 : vector<2x1xf32> to vector<2x1x1xf32>
    %59 = tpu.reciprocal %58 {approx = true} : vector<2x1x1xf32> -> vector<2x1x1xf32>
    %60 = vector.broadcast %59 : vector<2x1x1xf32> to vector<2x16x1xf32>
    %61 = arith.mulf %56, %60 : vector<2x16x1xf32>
    %62 = arith.truncf %61 : vector<2x16x1xf32> to vector<2x16x1xbf16>
    %cst_29 = arith.constant dense<0.000000e+00> : vector<2x1x128xf32>
    %63 = tpu.matmul %62, %0, %cst_29 {dimension_numbers = #tpu.dot_dimension_numbers<[1], [1], [2], [2], [0, 0, 0, 2, 1, 2], [0], [0]>} : vector<2x16x1xbf16>, vector<2x16x128xbf16>, vector<2x1x128xf32> -> vector<2x1x128xf32>
    %c0_30 = arith.constant 0 : index
    %c0_31 = arith.constant 0 : index
    %c0_32 = arith.constant 0 : index
    %64 = vector.load %arg9[%c0_30, %c0_31, %c0_32] : memref<2x1x128xf32, #tpu.memory_space<vmem>>, vector<2x1x128xf32>
    tpu.vector_store %arg9[%c0_30, %c0_31, %c0_32], %63 {strides = array<i32>} : memref<2x1x128xf32, #tpu.memory_space<vmem>>, vector<2x1x128xf32>,
    return
  }
  func.func @transform_0(%arg0: i32) -> (i32, i32, i32) {
    %c0_i32 = arith.constant 0 : i32
    %c0_i32_0 = arith.constant 0 : i32
    %c0_i32_1 = arith.constant 0 : i32
    return %arg0, %c0_i32, %c0_i32_0 : i32, i32, i32
  }
  func.func @transform_1(%arg0: i32) -> (i32, i32, i32) {
    %c0_i32 = arith.constant 0 : i32
    %c0_i32_0 = arith.constant 0 : i32
    %c0_i32_1 = arith.constant 0 : i32
    return %arg0, %c0_i32, %c0_i32_0 : i32, i32, i32
  }
  func.func @transform_2(%arg0: i32) -> (i32, i32) {
    %c0_i32 = arith.constant 0 : i32
    %c0_i32_0 = arith.constant 0 : i32
    %c0_i32_1 = arith.constant 0 : i32
    return %c0_i32, %c0_i32_0 : i32, i32
  }
  func.func @transform_3(%arg0: i32) -> (i32, i32) {
    %c0_i32 = arith.constant 0 : i32
    %c0_i32_0 = arith.constant 0 : i32
    %c0_i32_1 = arith.constant 0 : i32
    return %c0_i32, %c0_i32_0 : i32, i32
  }
  func.func @transform_4(%arg0: i32) -> (i32, i32) {
    %c0_i32 = arith.constant 0 : i32
    %c0_i32_0 = arith.constant 0 : i32
    %c0_i32_1 = arith.constant 0 : i32
    return %c0_i32, %c0_i32_0 : i32, i32
  }
  func.func @transform_5(%arg0: i32) -> (i32, i32) {
    %c0_i32 = arith.constant 0 : i32
    %c0_i32_0 = arith.constant 0 : i32
    %c0_i32_1 = arith.constant 0 : i32
    return %c0_i32, %c0_i32_0 : i32, i32
  }
  func.func @transform_6(%arg0: i32) -> (i32, i32) {
    %c0_i32 = arith.constant 0 : i32
    %c0_i32_0 = arith.constant 0 : i32
    %c0_i32_1 = arith.constant 0 : i32
    return %c0_i32, %c0_i32_0 : i32, i32
  }
  func.func @transform_7(%arg0: i32) -> (i32, i32) {
    %c0_i32 = arith.constant 0 : i32
    %c0_i32_0 = arith.constant 0 : i32
    %c0_i32_1 = arith.constant 0 : i32
    return %c0_i32, %c0_i32_0 : i32, i32
  }
  func.func @transform_8(%arg0: i32) -> (i32, i32, i32) {
    %c0_i32 = arith.constant 0 : i32
    %c0_i32_0 = arith.constant 0 : i32
    %c0_i32_1 = arith.constant 0 : i32
    return %arg0, %c0_i32, %c0_i32_0 : i32, i32, i32
  }
}

</mosaic_0001>

<bundles_post_ra>
// kernel: tpu_custom_call.1
= control target key start
LH: loop header
LB: loop body
LE: loop exit
PB: predicated region body
PF: predicated region fallthrough
CT: control target
= control target key end

     0   :  { %14 = vsyncpa [#allocation4], 0  ;;  %s810_s0 = inlined_call_operand.vmem [shape: bf16[2,16,128], index: 0, kind: input, shape index: {}]   ;;  %s811_s1 = inlined_call_operand.vmem [shape: f32[2,16,1], index: 1, kind: input, shape index: {}]   ;;  %s812_s2 = inlined_call_operand.hbm [shape: bf16[128,128], index: 2, kind: input, shape index: {}]   ;;  %s813_s3 = inlined_call_operand.vmem [shape: f32[1,128], index: 3, kind: input, shape index: {}]   ;;  %s814_s4 = inlined_call_operand.vmem [shape: f32[1,128], index: 4, kind: input, shape index: {}]   ;;  %s815_s5 = inlined_call_operand.vmem [shape: f32[1,128], index: 5, kind: input, shape index: {}]   ;;  %s816_s6 = inlined_call_operand.vmem [shape: f32[1,128], index: 6, kind: input, shape index: {}]   ;;  %s817_s7 = inlined_call_operand.<no memory space> [shape: f32[1,1], index: 7, kind: input, shape index: {}]   ;;  %s818_s8 = inlined_call_operand.hbm [shape: f32[2,1,128], index: 8, kind: output, shape index: {}]  }
   0x1   :  { %15 = vsyncpa [#allocation5], 0  ;;  %s666_s27 = smov [#allocation3]   ;;  %s618_s9 = scalar_lea.hbm %s812_s2, 1024 }
   0x2   :  { %s25_s28 = sshll.u32 %s666_s27, 4  ;;  %p619_p0 = scmp.ne.s32.totalorder %s812_s2, %s618_s9  ;;  %s26_s28 = int_to_ptr.vmem [resolvable:$true] %s25_s28 }
   0x3   :  { %p622_p1 = scmp.lt.u32.totalorder %s618_s9, %s812_s2 }
   0x5   :  { %p624_p2 = pnand %p622_p1, %p619_p0 }
   0x7   :  { %627 = shalt.err (!%p624_p2)
}
   0x8   :  { %s628_s14 = scalar_lea.vmem %s26_s28, 1024  ;;  %p633_p4 = scmp.lt.s32.totalorder %s26_s28, %s26_s28 }
   0x9   :  { %p629_p3 = scmp.ne.s32.totalorder %s26_s28, %s628_s14  ;;  %p634_p5 = scmp.lt.s32.totalorder %s628_s14, %s628_s14 }
   0xb   :  { %p635_p6 = por %p634_p5, %p633_p4 }
   0xd   :  { %p636_p7 = pnand %p635_p6, %p629_p3 }
   0xf   :  { %639 = shalt.err (!%p636_p7)
}
  0x10   :  { %s667_s15 = smov 64   ;;  %s668_s16 = smov 4  }
  0x11   :  { %31 = dma.hbm_to_vmem [thread:$0]  %s812_s2, 1024, %s26_s28, [#allocation4], %s667_s15, %s667_s15, %s668_s16  }
  0x12   :  { %662 = dma.done.wait [#allocation4], 1024  }
  0x13   :  { %663 = vsyncadd [#allocation4], 4294966272  ;;  %v580_v0 = vld [vmem:[#allocation3] sm:$0xff]   ;;  %v581_v1 = vld [vmem:[#allocation3 + $0x8] sm:$0xff]   ;;  %vm670_vm0 = vmmov 0   ;;  %vm314_vm1 = vcmask 7168  }
  0x14   :  { %539 = vmatprep.subr.bf16.mxu0 %v580_v0  ;;  %v582_v2 = vld [vmem:[#allocation3 + $0x10] sm:$0xff]   ;;  %v583_v3 = vld [vmem:[#allocation3 + $0x18] sm:$0xff]   ;;  %v734_v4 = vld [vmem:[%s810_s0] sm:$0xff]   ;;  %vm387_vm2 = vcmask 130048  }
  0x15   :  { %540 = vmatpush3.bf16.msra.mxu0 %v580_v0  ;;  %555 = vmatprep.mubr.bf16.mxu0 %v734_v4  ;;  %v584_v5 = vld [vmem:[#allocation3 + $0x20] sm:$0xff]   ;;  %v585_v6 = vld [vmem:[#allocation3 + $0x28] sm:$0xff]   ;;  %v586_v7 = vld [vmem:[#allocation3 + $0x30] sm:$0xff]  }
  0x16   :  { %541 = vmatprep.subr.bf16.mxu0 %v581_v1  ;;  %v587_v8 = vld [vmem:[#allocation3 + $0x38] sm:$0xff]   ;;  %v740_v9 = vld [vmem:[%s810_s0 + $0x8] sm:$0xff]   ;;  %v509_v10 = vld [vmem:[%s813_s3] ss:$0 sm:$0xff] }
  0x17   :  { %v520_v57 = vld [vmem:[%s814_s4] ss:$0 sm:$0xff] }
  0x18   :  { %v521_v59 = vld [vmem:[%s815_s5] ss:$0 sm:$0xff] }
  0x19   :  { %542 = vmatpush3.bf16.msra.mxu0 %v581_v1 }
  0x1a   :  { %543 = vmatprep.subr.bf16.mxu0 %v582_v2 }
  0x1d   :  { %544 = vmatpush3.bf16.msra.mxu0 %v582_v2 }
  0x1e   :  { %545 = vmatprep.subr.bf16.mxu0 %v583_v3 }
  0x21   :  { %546 = vmatpush3.bf16.msra.mxu0 %v583_v3 }
  0x22   :  { %547 = vmatprep.subr.bf16.mxu0 %v584_v5 }
  0x25   :  { %548 = vmatpush3.bf16.msra.mxu0 %v584_v5 }
  0x26   :  { %549 = vmatprep.subr.bf16.mxu0 %v585_v6 }
  0x29   :  { %550 = vmatpush3.bf16.msra.mxu0 %v585_v6 }
  0x2a   :  { %551 = vmatprep.subr.bf16.mxu0 %v586_v7 }
  0x2d   :  { %552 = vmatpush3.bf16.msra.mxu0 %v586_v7 }
  0x2e   :  { %553 = vmatprep.subr.bf16.mxu0 %v587_v8 }
  0x31   :  { %554 = vmatpush3.bf16.msra.mxu0 %v587_v8 }
  0x34   :  { %556 = vmatmul.mubr.bf16.vlgmr.msra.gmra.mrb[0].mxu0 %v740_v9 }
 0x107   :  { %v557_v11 = vpop.f32.mrb[0].mxu0 }
 0x108   :  { %v167_v12 = vpop.f32.mrb[1].mxu0  ;;  %v746_v19 = vadd.f32 %v557_v11, %v509_v10 }
 0x109   :  { %v168_v13 = vadd.f32 %v509_v10, %v167_v12  ;;  %v558_v14 = vpop.f32.mrb[2].mxu0 }
 0x10a   :  { %v170_v15 = vpop.f32.mrb[3].mxu0  ;;  %v748_v20 = vadd.f32 %v558_v14, %v509_v10  ;;  %v197_v21 = vmul.f32 %v746_v19, %v746_v19 }
 0x10b   :  { %v171_v16 = vadd.f32 %v509_v10, %v170_v15  ;;  %182 = vadd.xlane.f32.xlu0 %v168_v13  ;;  %v195_v17 = vmul.f32 %v168_v13, %v168_v13 }
 0x10c   :  { %v198_v22 = vmul.f32 %v748_v20, %v748_v20 }
 0x10d   :  { %199 = vadd.xlane.f32.xlu1 %v195_v17  ;;  %v196_v18 = vmul.f32 %v171_v16, %v171_v16 }
 0x10f   :  { %184 = vadd.xlane.f32.xlu0 %v171_v16 }
 0x111   :  { %201 = vadd.xlane.f32.xlu1 %v196_v18 }
 0x113   :  { %186 = vadd.xlane.f32.xlu0 %v746_v19 }
 0x115   :  { %188 = vadd.xlane.f32.xlu1 %v748_v20 }
 0x117   :  { %203 = vadd.xlane.f32.xlu0 %v197_v21 }
 0x119   :  { %205 = vadd.xlane.f32.xlu1 %v198_v22 }
 0x198   :  { %v183_v23 = vpop.xlane.xlu0 %182 }
 0x199   :  { %v191_v24 = vmul.f32 0.0078125, %v183_v23  ;;  %v522_v23 = vld [vmem:[%s816_s6] ss:$0 sm:$0xff] }
 0x19a   :  { %v200_v25 = vpop.xlane.xlu1 %199 }
 0x19b   :  { %v211_v26 = vmul.f32 %v191_v24, %v191_v24  ;;  %v207_v27 = vmul.f32 0.0078125, %v200_v25  ;;  %v223_v54 = vsub.f32 %v168_v13, %v191_v24 }
 0x19c   :  { %v185_v28 = vpop.xlane.xlu0 %184 }
 0x19d   :  { %v215_v29 = vsub.f32 %v207_v27, %v211_v26  ;;  %v192_v30 = vmul.f32 0.0078125, %v185_v28 }
 0x19e   :  { %v202_v31 = vpop.xlane.xlu1 %201 }
 0x19f   :  { %v219_v32 = vmax.f32 %v215_v29, 0.0  ;;  %v212_v33 = vmul.f32 %v192_v30, %v192_v30  ;;  %v208_v34 = vmul.f32 0.0078125, %v202_v31  ;;  %v224_v60 = vsub.f32 %v171_v16, %v192_v30 }
 0x1a0   :  { %v187_v35 = vpop.xlane.xlu0 %186 }
 0x1a1   :  { %v227_v36 = vadd.f32 1e-05, %v219_v32  ;;  %v216_v37 = vsub.f32 %v208_v34, %v212_v33  ;;  %v193_v38 = vmul.f32 0.0078125, %v187_v35 }
 0x1a2   :  { %v189_v39 = vpop.xlane.xlu1 %188 }
 0x1a3   :  { %590 = vrsqrt.f32 %v227_v36  ;;  %v220_v40 = vmax.f32 %v216_v37, 0.0  ;;  %v194_v41 = vmul.f32 0.0078125, %v189_v39  ;;  %v213_v44 = vmul.f32 %v193_v38, %v193_v38 }
 0x1a4   :  { %v204_v42 = vpop.xlane.xlu0 %203  ;;  %v225_v3 = vsub.f32 %v746_v19, %v193_v38 }
 0x1a5   :  { %v228_v43 = vadd.f32 1e-05, %v220_v40  ;;  %v209_v45 = vmul.f32 0.0078125, %v204_v42  ;;  %v214_v47 = vmul.f32 %v194_v41, %v194_v41  ;;  %v226_v7 = vsub.f32 %v748_v20, %v194_v41 }
 0x1a6   :  { %v206_v46 = vpop.xlane.xlu1 %205  ;;  %v669_v40 = vmov 0.0   ;;  %v301_v41 = vstv %s817_s7 }
 0x1a7   :  { %592 = vrsqrt.f32 %v228_v43  ;;  %v217_v48 = vsub.f32 %v209_v45, %v213_v44  ;;  %v210_v49 = vmul.f32 0.0078125, %v206_v46  ;;  %559 = vmatprep.subr.bf16.mxu1 %v669_v40  ;;  %561 = vmatprep.mubr.msk.bf16.mxu1 %vm670_vm0, %v669_v40  ;;  %v306_v44 = vld [vmem:[%s811_s1] sm:$0xff]  ;;  %v307_v45 = vld [vmem:[%s811_s1 + $0x8] sm:$0xff] }
 0x1a8   :  { %560 = vmatpush3.bf16.msra.mxu1 %v734_v4 }
 0x1a9   :  { %v221_v50 = vmax.f32 %v217_v48, 0.0  ;;  %v218_v51 = vsub.f32 %v210_v49, %v214_v47  ;;  %565 = vmatprep.subr.bf16.mxu1 %v669_v40 }
 0x1ab   :  { %v229_v52 = vadd.f32 1e-05, %v221_v50  ;;  %v222_v53 = vmax.f32 %v218_v51, 0.0 }
 0x1ad   :  { %v591_v55 = vpop.eup %590  ;;  %594 = vrsqrt.f32 %v229_v52  ;;  %v230_v56 = vadd.f32 1e-05, %v222_v53  ;;  %v308_v52 = vld [vmem:[%s811_s1 + $0x10] sm:$0xff] }
 0x1ae   :  { %v235_v58 = vmul.f32 %v591_v55, %v223_v54 }
 0x1af   :  { %596 = vrsqrt.f32 %v230_v56  ;;  %v309_v56 = vld [vmem:[%s811_s1 + $0x18] sm:$0xff]  ;;  %s671_s1 = smov [#allocation6]  }
 0x1b0   :  { %v246_v61 = vmul.f32 %v520_v57, %v235_v58  ;;  %s497_s12 = sshll.u32 %s671_s1, 4  ;;  %s498_s12 = int_to_ptr.vmem [resolvable:$true] %s497_s12 }
 0x1b1   :  { %v593_v62 = vpop.eup %592  ;;  %s640_s13 = scalar_lea.vmem %s498_s12, 32  ;;  %p645_p9 = scmp.lt.s32.totalorder %s498_s12, %s498_s12 }
 0x1b2   :  { %v257_v63 = vadd.f32 %v521_v59, %v246_v61  ;;  %v236_v0 = vmul.f32 %v593_v62, %v224_v60  ;;  %p641_p8 = scmp.ne.s32.totalorder %s498_s12, %s640_s13  ;;  %p646_p10 = scmp.lt.s32.totalorder %s640_s13, %s640_s13 }
 0x1b4   :  { %v265_v1 = vmul.f32 0.70710677, %v257_v63  ;;  %v247_v2 = vmul.f32 %v520_v57, %v236_v0  ;;  %v261_v22 = vmul.f32 0.5, %v257_v63  ;;  %p647_p11 = por %p646_p10, %p645_p9 }
 0x1b6   :  { %598 = verf.f32 %v265_v1  ;;  %v258_v5 = vadd.f32 %v521_v59, %v247_v2  ;;  %p648_p12 = pnand %p647_p11, %p641_p8 }
 0x1b7   :  { %v595_v6 = vpop.eup %594 }
 0x1b8   :  { %v266_v8 = vmul.f32 0.70710677, %v258_v5  ;;  %v237_v10 = vmul.f32 %v595_v6, %v225_v3  ;;  %v262_v26 = vmul.f32 0.5, %v258_v5 }
 0x1b9   :  { %v597_v11 = vpop.eup %596 }
 0x1ba   :  { %600 = verf.f32 %v266_v8  ;;  %v248_v12 = vmul.f32 %v520_v57, %v237_v10  ;;  %v238_v13 = vmul.f32 %v597_v11, %v226_v7 }
 0x1bc   :  { %v259_v14 = vadd.f32 %v521_v59, %v248_v12  ;;  %v249_v15 = vmul.f32 %v520_v57, %v238_v13 }
 0x1be   :  { %v267_v16 = vmul.f32 0.70710677, %v259_v14  ;;  %v260_v17 = vadd.f32 %v521_v59, %v249_v15  ;;  %v263_v31 = vmul.f32 0.5, %v259_v14 }
 0x1c0   :  { %v599_v18 = vpop.eup %598  ;;  %602 = verf.f32 %v267_v16  ;;  %v268_v21 = vmul.f32 0.70710677, %v260_v17  ;;  %v264_v35 = vmul.f32 0.5, %v260_v17 }
 0x1c1   :  { %v273_v19 = vadd.f32 1.0, %v599_v18 }
 0x1c2   :  { %604 = verf.f32 %v268_v21 }
 0x1c3   :  { %v277_v20 = vmul.f32 %v273_v19, %v261_v22 }
 0x1c4   :  { %v601_v24 = vpop.eup %600 }
 0x1c5   :  { %v288_v25 = vmul.f32 %v522_v23, %v277_v20  ;;  %v274_v27 = vadd.f32 1.0, %v601_v24 }
 0x1c7   :  { %292 = vadd.xlane.f32.xlu0 %v288_v25  ;;  %v278_v28 = vmul.f32 %v274_v27, %v262_v26 }
 0x1c9   :  { %v289_v29 = vmul.f32 %v522_v23, %v278_v28 }
 0x1ca   :  { %v603_v30 = vpop.eup %602 }
 0x1cb   :  { %294 = vadd.xlane.f32.xlu1 %v289_v29  ;;  %v275_v32 = vadd.f32 1.0, %v603_v30 }
 0x1cc   :  { %v605_v33 = vpop.eup %604 }
 0x1cd   :  { %v279_v34 = vmul.f32 %v275_v32, %v263_v31  ;;  %v276_v36 = vadd.f32 1.0, %v605_v33 }
 0x1cf   :  { %v290_v37 = vmul.f32 %v522_v23, %v279_v34  ;;  %v280_v38 = vmul.f32 %v276_v36, %v264_v35 }
 0x1d1   :  { %296 = vadd.xlane.f32.xlu0 %v290_v37  ;;  %v291_v39 = vmul.f32 %v522_v23, %v280_v38 }
 0x1d3   :  { %298 = vadd.xlane.f32.xlu1 %v291_v39 }
 0x254   :  { %v293_v42 = vpop.xlane.xlu0 %292 }
 0x255   :  { %v302_v43 = vadd.f32 %v301_v41, %v293_v42 }
 0x257   :  { %v310_v47 = vadd.f32 %v306_v44, %v302_v43 }
 0x258   :  { %v295_v46 = vpop.xlane.xlu1 %294 }
 0x259   :  { %v303_v48 = vadd.f32 %v301_v41, %v295_v46  ;;  %v315_v49 = vsel %vm314_vm1, %v310_v47, -inf }
 0x25b   :  { %v311_v4 = vadd.f32 %v307_v45, %v303_v48 }
 0x25d   :  { %v316_v50 = vsel %vm314_vm1, %v311_v4, -inf }
 0x25e   :  { %v317_v51 = vmax.f32 %v315_v49, %v316_v50  ;;  %v297_v53 = vpop.xlane.xlu0 %296 }
 0x25f   :  { %v304_v54 = vadd.f32 %v301_v41, %v297_v53 }
 0x260   :  { %v318_v55 = vrot.slane %v317_v51, 4  ;;  %v299_v57 = vpop.xlane.xlu1 %298 }
 0x261   :  { %v312_v58 = vadd.f32 %v308_v52, %v304_v54  ;;  %v305_v59 = vadd.f32 %v301_v41, %v299_v57 }
 0x262   :  { %v319_v60 = vmax.f32 %v317_v51, %v318_v55 }
 0x263   :  { %v313_v61 = vadd.f32 %v309_v56, %v305_v59  ;;  %v324_v63 = vsel %vm314_vm1, %v312_v58, -inf }
 0x264   :  { %v320_v62 = vrot.slane %v319_v60, 2 }
 0x265   :  { %v325_v0 = vsel %vm314_vm1, %v313_v61, -inf }
 0x266   :  { %v321_v1 = vmax.f32 %v319_v60, %v320_v62  ;;  %v326_v2 = vmax.f32 %v324_v63, %v325_v0 }
 0x268   :  { %v322_v3 = vrot.slane %v321_v1, 1  ;;  %v327_v5 = vrot.slane %v326_v2, 4 }
 0x26a   :  { %v323_v6 = vmax.f32 %v321_v1, %v322_v3  ;;  %v328_v7 = vmax.f32 %v326_v2, %v327_v5 }
 0x26c   :  { %v333_v8 = vsub.f32 %v310_v47, %v323_v6  ;;  %v334_v10 = vsub.f32 %v311_v4, %v323_v6  ;;  %v329_v11 = vrot.slane %v328_v7, 2 }
 0x26e   :  { %v337_v12 = vmul.f32 1.442695, %v333_v8  ;;  %v339_v13 = vmul.f32 1.442695, %v334_v10  ;;  %v330_v14 = vmax.f32 %v328_v7, %v329_v11 }
 0x270   :  { %606 = vpow2.f32 %v337_v12  ;;  %v331_v15 = vrot.slane %v330_v14, 1 }
 0x271   :  { %608 = vpow2.f32 %v339_v13 }
 0x272   :  { %v332_v16 = vmax.f32 %v330_v14, %v331_v15 }
 0x274   :  { %v335_v17 = vsub.f32 %v312_v58, %v332_v16  ;;  %v336_v18 = vsub.f32 %v313_v61, %v332_v16 }
 0x276   :  { %v341_v21 = vmul.f32 1.442695, %v335_v17  ;;  %v343_v22 = vmul.f32 1.442695, %v336_v18 }
 0x278   :  { %610 = vpow2.f32 %v341_v21 }
 0x279   :  { %612 = vpow2.f32 %v343_v22 }
 0x27a   :  { %v607_v19 = vpop.eup %606 }
 0x27b   :  { %v609_v23 = vpop.eup %608  ;;  %v345_v20 = vsel %vm314_vm1, %v607_v19, 0.0 }
 0x27c   :  { %v346_v24 = vsel %vm314_vm1, %v609_v23, 0.0 }
 0x27d   :  { %v347_v25 = vadd.f32 %v346_v24, %v345_v20 }
 0x27f   :  { %v348_v26 = vrot.slane %v347_v25, 4 }
 0x281   :  { %v349_v27 = vadd.f32 %v348_v26, %v347_v25 }
 0x282   :  { %v611_v28 = vpop.eup %610 }
 0x283   :  { %v613_v29 = vpop.eup %612  ;;  %v354_v30 = vsel %vm314_vm1, %v611_v28, 0.0  ;;  %v350_v31 = vrot.slane %v349_v27, 2 }
 0x284   :  { %v355_v32 = vsel %vm314_vm1, %v613_v29, 0.0 }
 0x285   :  { %v356_v33 = vadd.f32 %v355_v32, %v354_v30  ;;  %v351_v34 = vadd.f32 %v350_v31, %v349_v27 }
 0x287   :  { %v357_v35 = vrot.slane %v356_v33, 4  ;;  %v352_v36 = vrot.slane %v351_v34, 1 }
 0x289   :  { %v353_v37 = vadd.f32 %v352_v36, %v351_v34  ;;  %v358_v38 = vadd.f32 %v357_v35, %v356_v33 }
 0x28b   :  { %614 = vrcp.f32 %v353_v37  ;;  %v359_v39 = vrot.slane %v358_v38, 2 }
 0x28d   :  { %v360_v41 = vadd.f32 %v359_v39, %v358_v38 }
 0x28f   :  { %v361_v42 = vrot.slane %v360_v41, 1 }
 0x291   :  { %v362_v43 = vadd.f32 %v361_v42, %v360_v41 }
 0x293   :  { %616 = vrcp.f32 %v362_v43 }
 0x295   :  { %v615_v44 = vpop.eup %614 }
 0x296   :  { %v365_v45 = vmul.f32 %v615_v44, %v607_v19  ;;  %v366_v46 = vmul.f32 %v615_v44, %v609_v23 }
 0x298   :  { %v369_v47 = vpack.c.bf16 %v366_v46, %v365_v45 }
 0x29a   :  { %371 = vxpose.xlu0.c.b16.start.end [1/1] (short) (narrow) %v369_v47, 16 }
 0x29d   :  { %v617_v48 = vpop.eup %616 }
 0x29e   :  { %v367_v4 = vmul.f32 %v617_v48, %v611_v28  ;;  %v368_v49 = vmul.f32 %v617_v48, %v613_v29 }
 0x2a0   :  { %v370_v50 = vpack.c.bf16 %v368_v49, %v367_v4 }
 0x2a2   :  { %431 = vxpose.xlu1.c.b16.start.end [1/1] (short) (narrow) %v370_v50, 16 }
 0x300   :  { %v379_v51 = vpop.trf.xlu0 }
 0x301   :  { %562 = vmatmul.mubr.msk.bf16.vlgmr.msra.gmra.mrb[0].mxu1 %vm387_vm2, %v379_v51 }
 0x302   :  { %566 = vmatpush3.bf16.msra.mxu1 %v740_v9  ;;  %567 = vmatprep.mubr.msk.bf16.mxu1 %vm670_vm0, %v669_v40 }
 0x308   :  { %v439_v52 = vpop.trf.xlu1 }
 0x309   :  { %568 = vmatmul.mubr.msk.bf16.vlgmr.msra.gmra.mrb[4].mxu1 %vm387_vm2, %v439_v52 }
 0x3d4   :  { %v425_v53 = vpop.f32.mrb[0].mxu1 }
 0x3d5   :  { %490 = vst [vmem:[#allocation6] sm:$0x1] %v425_v53  ;;  %v563_v54 = vpop.f32.mrb[1].mxu1 }
 0x3d6   :  { %v428_v55 = vpop.f32.mrb[2].mxu1 }
 0x3d7   :  { %v564_v56 = vpop.f32.mrb[3].mxu1 }
 0x3dc   :  { %v484_v57 = vpop.f32.mrb[4].mxu1 }
 0x3dd   :  { %491 = vst [vmem:[#allocation6 + $0x1] sm:$0x1] %v484_v57  ;;  %v569_v58 = vpop.f32.mrb[5].mxu1 }
 0x3de   :  { %v487_v59 = vpop.f32.mrb[6].mxu1 }
 0x3df   :  { %651 = shalt.err (!%p648_p12)
}
 0x3e0   :  { %s652_s16 = scalar_lea.hbm %s818_s8, 32 }
 0x3e1   :  { %p653_p13 = scmp.ne.s32.totalorder %s818_s8, %s652_s16  ;;  %p656_p0 = scmp.lt.u32.totalorder %s652_s16, %s818_s8 }
 0x3e3   :  { %p658_p1 = pnand %p656_p0, %p653_p13 }
 0x3e5   :  { %661 = shalt.err (!%p658_p1)
}
 0x3e6   :  { %s672_s2 = smov 16   ;;  %s673_s21 = smov 1   ;;  %v570_v9 = vpop.f32.mrb[7].mxu1 }
 0x3e7   :  { %503 = dma.vmem_to_hbm [thread:$0]  %s498_s12, 32, %s818_s8, [#allocation5], %s672_s2, %s672_s2, %s673_s21  }
 0x3e8   :  { %664 = dma.done.wait [#allocation5], 32  }
 0x3e9   :  { %665 = vsyncadd [#allocation5], 4294967264 }
 0x3ea   :  { %507 = vsyncpa [#allocation4], 1 }
 0x3eb   :  { %508 = vsyncpa [#allocation5], 1 }

// kernel: tpu_custom_call.1
= control target key start
LH: loop header
LB: loop body
LE: loop exit
PB: predicated region body
PF: predicated region fallthrough
CT: control target
= control target key end

     0   :  { %14 = vsyncpa [#allocation4], 0  ;;  %s810_s0 = inlined_call_operand.vmem [shape: bf16[2,16,128], index: 0, kind: input, shape index: {}]   ;;  %s811_s1 = inlined_call_operand.vmem [shape: f32[2,16,1], index: 1, kind: input, shape index: {}]   ;;  %s812_s2 = inlined_call_operand.hbm [shape: bf16[128,128], index: 2, kind: input, shape index: {}]   ;;  %s813_s3 = inlined_call_operand.vmem [shape: f32[1,128], index: 3, kind: input, shape index: {}]   ;;  %s814_s4 = inlined_call_operand.vmem [shape: f32[1,128], index: 4, kind: input, shape index: {}]   ;;  %s815_s5 = inlined_call_operand.vmem [shape: f32[1,128], index: 5, kind: input, shape index: {}]   ;;  %s816_s6 = inlined_call_operand.vmem [shape: f32[1,128], index: 6, kind: input, shape index: {}]   ;;  %s817_s7 = inlined_call_operand.<no memory space> [shape: f32[1,1], index: 7, kind: input, shape index: {}]   ;;  %s818_s8 = inlined_call_operand.hbm [shape: f32[2,1,128], index: 8, kind: output, shape index: {}]  }
   0x1   :  { %15 = vsyncpa [#allocation5], 0  ;;  %s666_s27 = smov [#allocation3]   ;;  %s618_s9 = scalar_lea.hbm %s812_s2, 1024 }
   0x2   :  { %s25_s28 = sshll.u32 %s666_s27, 4  ;;  %p619_p0 = scmp.ne.s32.totalorder %s812_s2, %s618_s9  ;;  %s26_s28 = int_to_ptr.vmem [resolvable:$true] %s25_s28 }
   0x3   :  { %p622_p1 = scmp.lt.u32.totalorder %s618_s9, %s812_s2 }
   0x5   :  { %p624_p2 = pnand %p622_p1, %p619_p0 }
   0x7   :  { %627 = shalt.err (!%p624_p2)
}
   0x8   :  { %s628_s14 = scalar_lea.vmem %s26_s28, 1024  ;;  %p633_p4 = scmp.lt.s32.totalorder %s26_s28, %s26_s28 }
   0x9   :  { %p629_p3 = scmp.ne.s32.totalorder %s26_s28, %s628_s14  ;;  %p634_p5 = scmp.lt.s32.totalorder %s628_s14, %s628_s14 }
   0xb   :  { %p635_p6 = por %p634_p5, %p633_p4 }
   0xd   :  { %p636_p7 = pnand %p635_p6, %p629_p3 }
   0xf   :  { %639 = shalt.err (!%p636_p7)
}
  0x10   :  { %s667_s15 = smov 64   ;;  %s668_s16 = smov 4  }
  0x11   :  { %31 = dma.hbm_to_vmem [thread:$0]  %s812_s2, 1024, %s26_s28, [#allocation4], %s667_s15, %s667_s15, %s668_s16  }
  0x12   :  { %662 = dma.done.wait [#allocation4], 1024  }
  0x13   :  { %663 = vsyncadd [#allocation4], 4294966272  ;;  %v580_v0 = vld [vmem:[#allocation3] sm:$0xff]   ;;  %v581_v1 = vld [vmem:[#allocation3 + $0x8] sm:$0xff]   ;;  %vm670_vm0 = vmmov 0   ;;  %vm314_vm1 = vcmask 7168  }
  0x14   :  { %539 = vmatprep.subr.bf16.mxu0 %v580_v0  ;;  %v582_v2 = vld [vmem:[#allocation3 + $0x10] sm:$0xff]   ;;  %v583_v3 = vld [vmem:[#allocation3 + $0x18] sm:$0xff]   ;;  %v734_v4 = vld [vmem:[%s810_s0] sm:$0xff]   ;;  %vm387_vm2 = vcmask 130048  }
  0x15   :  { %540 = vmatpush3.bf16.msra.mxu0 %v580_v0  ;;  %555 = vmatprep.mubr.bf16.mxu0 %v734_v4  ;;  %v584_v5 = vld [vmem:[#allocation3 + $0x20] sm:$0xff]   ;;  %v585_v6 = vld [vmem:[#allocation3 + $0x28] sm:$0xff]   ;;  %v586_v7 = vld [vmem:[#allocation3 + $0x30] sm:$0xff]  }
  0x16   :  { %541 = vmatprep.subr.bf16.mxu0 %v581_v1  ;;  %v587_v8 = vld [vmem:[#allocation3 + $0x38] sm:$0xff]   ;;  %v740_v9 = vld [vmem:[%s810_s0 + $0x8] sm:$0xff]   ;;  %v509_v10 = vld [vmem:[%s813_s3] ss:$0 sm:$0xff] }
  0x17   :  { %v520_v57 = vld [vmem:[%s814_s4] ss:$0 sm:$0xff] }
  0x18   :  { %v521_v59 = vld [vmem:[%s815_s5] ss:$0 sm:$0xff] }
  0x19   :  { %542 = vmatpush3.bf16.msra.mxu0 %v581_v1 }
  0x1a   :  { %543 = vmatprep.subr.bf16.mxu0 %v582_v2 }
  0x1d   :  { %544 = vmatpush3.bf16.msra.mxu0 %v582_v2 }
  0x1e   :  { %545 = vmatprep.subr.bf16.mxu0 %v583_v3 }
  0x21   :  { %546 = vmatpush3.bf16.msra.mxu0 %v583_v3 }
  0x22   :  { %547 = vmatprep.subr.bf16.mxu0 %v584_v5 }
  0x25   :  { %548 = vmatpush3.bf16.msra.mxu0 %v584_v5 }
  0x26   :  { %549 = vmatprep.subr.bf16.mxu0 %v585_v6 }
  0x29   :  { %550 = vmatpush3.bf16.msra.mxu0 %v585_v6 }
  0x2a   :  { %551 = vmatprep.subr.bf16.mxu0 %v586_v7 }
  0x2d   :  { %552 = vmatpush3.bf16.msra.mxu0 %v586_v7 }
  0x2e   :  { %553 = vmatprep.subr.bf16.mxu0 %v587_v8 }
  0x31   :  { %554 = vmatpush3.bf16.msra.mxu0 %v587_v8 }
  0x34   :  { %556 = vmatmul.mubr.bf16.vlgmr.msra.gmra.mrb[0].mxu0 %v740_v9 }
 0x107   :  { %v557_v11 = vpop.f32.mrb[0].mxu0 }
 0x108   :  { %v167_v12 = vpop.f32.mrb[1].mxu0  ;;  %v746_v19 = vadd.f32 %v557_v11, %v509_v10 }
 0x109   :  { %v168_v13 = vadd.f32 %v509_v10, %v167_v12  ;;  %v558_v14 = vpop.f32.mrb[2].mxu0 }
 0x10a   :  { %v170_v15 = vpop.f32.mrb[3].mxu0  ;;  %v748_v20 = vadd.f32 %v558_v14, %v509_v10  ;;  %v197_v21 = vmul.f32 %v746_v19, %v746_v19 }
 0x10b   :  { %v171_v16 = vadd.f32 %v509_v10, %v170_v15  ;;  %182 = vadd.xlane.f32.xlu0 %v168_v13  ;;  %v195_v17 = vmul.f32 %v168_v13, %v168_v13 }
 0x10c   :  { %v198_v22 = vmul.f32 %v748_v20, %v748_v20 }
 0x10d   :  { %199 = vadd.xlane.f32.xlu1 %v195_v17  ;;  %v196_v18 = vmul.f32 %v171_v16, %v171_v16 }
 0x10f   :  { %184 = vadd.xlane.f32.xlu0 %v171_v16 }
 0x111   :  { %201 = vadd.xlane.f32.xlu1 %v196_v18 }
 0x113   :  { %186 = vadd.xlane.f32.xlu0 %v746_v19 }
 0x115   :  { %188 = vadd.xlane.f32.xlu1 %v748_v20 }
 0x117   :  { %203 = vadd.xlane.f32.xlu0 %v197_v21 }
 0x119   :  { %205 = vadd.xlane.f32.xlu1 %v198_v22 }
 0x198   :  { %v183_v23 = vpop.xlane.xlu0 %182 }
 0x199   :  { %v191_v24 = vmul.f32 0.0078125, %v183_v23  ;;  %v522_v23 = vld [vmem:[%s816_s6] ss:$0 sm:$0xff] }
 0x19a   :  { %v200_v25 = vpop.xlane.xlu1 %199 }
 0x19b   :  { %v211_v26 = vmul.f32 %v191_v24, %v191_v24  ;;  %v207_v27 = vmul.f32 0.0078125, %v200_v25  ;;  %v223_v54 = vsub.f32 %v168_v13, %v191_v24 }
 0x19c   :  { %v185_v28 = vpop.xlane.xlu0 %184 }
 0x19d   :  { %v215_v29 = vsub.f32 %v207_v27, %v211_v26  ;;  %v192_v30 = vmul.f32 0.0078125, %v185_v28 }
 0x19e   :  { %v202_v31 = vpop.xlane.xlu1 %201 }
 0x19f   :  { %v219_v32 = vmax.f32 %v215_v29, 0.0  ;;  %v212_v33 = vmul.f32 %v192_v30, %v192_v30  ;;  %v208_v34 = vmul.f32 0.0078125, %v202_v31  ;;  %v224_v60 = vsub.f32 %v171_v16, %v192_v30 }
 0x1a0   :  { %v187_v35 = vpop.xlane.xlu0 %186 }
 0x1a1   :  { %v227_v36 = vadd.f32 1e-05, %v219_v32  ;;  %v216_v37 = vsub.f32 %v208_v34, %v212_v33  ;;  %v193_v38 = vmul.f32 0.0078125, %v187_v35 }
 0x1a2   :  { %v189_v39 = vpop.xlane.xlu1 %188 }
 0x1a3   :  { %590 = vrsqrt.f32 %v227_v36  ;;  %v220_v40 = vmax.f32 %v216_v37, 0.0  ;;  %v194_v41 = vmul.f32 0.0078125, %v189_v39  ;;  %v213_v44 = vmul.f32 %v193_v38, %v193_v38 }
 0x1a4   :  { %v204_v42 = vpop.xlane.xlu0 %203  ;;  %v225_v3 = vsub.f32 %v746_v19, %v193_v38 }
 0x1a5   :  { %v228_v43 = vadd.f32 1e-05, %v220_v40  ;;  %v209_v45 = vmul.f32 0.0078125, %v204_v42  ;;  %v214_v47 = vmul.f32 %v194_v41, %v194_v41  ;;  %v226_v7 = vsub.f32 %v748_v20, %v194_v41 }
 0x1a6   :  { %v206_v46 = vpop.xlane.xlu1 %205  ;;  %v669_v40 = vmov 0.0   ;;  %v301_v41 = vstv %s817_s7 }
 0x1a7   :  { %592 = vrsqrt.f32 %v228_v43  ;;  %v217_v48 = vsub.f32 %v209_v45, %v213_v44  ;;  %v210_v49 = vmul.f32 0.0078125, %v206_v46  ;;  %559 = vmatprep.subr.bf16.mxu1 %v669_v40  ;;  %561 = vmatprep.mubr.msk.bf16.mxu1 %vm670_vm0, %v669_v40  ;;  %v306_v44 = vld [vmem:[%s811_s1] sm:$0xff]  ;;  %v307_v45 = vld [vmem:[%s811_s1 + $0x8] sm:$0xff] }
 0x1a8   :  { %560 = vmatpush3.bf16.msra.mxu1 %v734_v4 }
 0x1a9   :  { %v221_v50 = vmax.f32 %v217_v48, 0.0  ;;  %v218_v51 = vsub.f32 %v210_v49, %v214_v47  ;;  %565 = vmatprep.subr.bf16.mxu1 %v669_v40 }
 0x1ab   :  { %v229_v52 = vadd.f32 1e-05, %v221_v50  ;;  %v222_v53 = vmax.f32 %v218_v51, 0.0 }
 0x1ad   :  { %v591_v55 = vpop.eup %590  ;;  %594 = vrsqrt.f32 %v229_v52  ;;  %v230_v56 = vadd.f32 1e-05, %v222_v53  ;;  %v308_v52 = vld [vmem:[%s811_s1 + $0x10] sm:$0xff] }
 0x1ae   :  { %v235_v58 = vmul.f32 %v591_v55, %v223_v54 }
 0x1af   :  { %596 = vrsqrt.f32 %v230_v56  ;;  %v309_v56 = vld [vmem:[%s811_s1 + $0x18] sm:$0xff]  ;;  %s671_s1 = smov [#allocation6]  }
 0x1b0   :  { %v246_v61 = vmul.f32 %v520_v57, %v235_v58  ;;  %s497_s12 = sshll.u32 %s671_s1, 4  ;;  %s498_s12 = int_to_ptr.vmem [resolvable:$true] %s497_s12 }
 0x1b1   :  { %v593_v62 = vpop.eup %592  ;;  %s640_s13 = scalar_lea.vmem %s498_s12, 32  ;;  %p645_p9 = scmp.lt.s32.totalorder %s498_s12, %s498_s12 }
 0x1b2   :  { %v257_v63 = vadd.f32 %v521_v59, %v246_v61  ;;  %v236_v0 = vmul.f32 %v593_v62, %v224_v60  ;;  %p641_p8 = scmp.ne.s32.totalorder %s498_s12, %s640_s13  ;;  %p646_p10 = scmp.lt.s32.totalorder %s640_s13, %s640_s13 }
 0x1b4   :  { %v265_v1 = vmul.f32 0.70710677, %v257_v63  ;;  %v247_v2 = vmul.f32 %v520_v57, %v236_v0  ;;  %v261_v22 = vmul.f32 0.5, %v257_v63  ;;  %p647_p11 = por %p646_p10, %p645_p9 }
 0x1b6   :  { %598 = verf.f32 %v265_v1  ;;  %v258_v5 = vadd.f32 %v521_v59, %v247_v2  ;;  %p648_p12 = pnand %p647_p11, %p641_p8 }
 0x1b7   :  { %v595_v6 = vpop.eup %594 }
 0x1b8   :  { %v266_v8 = vmul.f32 0.70710677, %v258_v5  ;;  %v237_v10 = vmul.f32 %v595_v6, %v225_v3  ;;  %v262_v26 = vmul.f32 0.5, %v258_v5 }
 0x1b9   :  { %v597_v11 = vpop.eup %596 }
 0x1ba   :  { %600 = verf.f32 %v266_v8  ;;  %v248_v12 = vmul.f32 %v520_v57, %v237_v10  ;;  %v238_v13 = vmul.f32 %v597_v11, %v226_v7 }
 0x1bc   :  { %v259_v14 = vadd.f32 %v521_v59, %v248_v12  ;;  %v249_v15 = vmul.f32 %v520_v57, %v238_v13 }
 0x1be   :  { %v267_v16 = vmul.f32 0.70710677, %v259_v14  ;;  %v260_v17 = vadd.f32 %v521_v59, %v249_v15  ;;  %v263_v31 = vmul.f32 0.5, %v259_v14 }
 0x1c0   :  { %v599_v18 = vpop.eup %598  ;;  %602 = verf.f32 %v267_v16  ;;  %v268_v21 = vmul.f32 0.70710677, %v260_v17  ;;  %v264_v35 = vmul.f32 0.5, %v260_v17 }
 0x1c1   :  { %v273_v19 = vadd.f32 1.0, %v599_v18 }
 0x1c2   :  { %604 = verf.f32 %v268_v21 }
 0x1c3   :  { %v277_v20 = vmul.f32 %v273_v19, %v261_v22 }
 0x1c4   :  { %v601_v24 = vpop.eup %600 }
 0x1c5   :  { %v288_v25 = vmul.f32 %v522_v23, %v277_v20  ;;  %v274_v27 = vadd.f32 1.0, %v601_v24 }
 0x1c7   :  { %292 = vadd.xlane.f32.xlu0 %v288_v25  ;;  %v278_v28 = vmul.f32 %v274_v27, %v262_v26 }
 0x1c9   :  { %v289_v29 = vmul.f32 %v522_v23, %v278_v28 }
 0x1ca   :  { %v603_v30 = vpop.eup %602 }
 0x1cb   :  { %294 = vadd.xlane.f32.xlu1 %v289_v29  ;;  %v275_v32 = vadd.f32 1.0, %v603_v30 }
 0x1cc   :  { %v605_v33 = vpop.eup %604 }
 0x1cd   :  { %v279_v34 = vmul.f32 %v275_v32, %v263_v31  ;;  %v276_v36 = vadd.f32 1.0, %v605_v33 }
 0x1cf   :  { %v290_v37 = vmul.f32 %v522_v23, %v279_v34  ;;  %v280_v38 = vmul.f32 %v276_v36, %v264_v35 }
 0x1d1   :  { %296 = vadd.xlane.f32.xlu0 %v290_v37  ;;  %v291_v39 = vmul.f32 %v522_v23, %v280_v38 }
 0x1d3   :  { %298 = vadd.xlane.f32.xlu1 %v291_v39 }
 0x254   :  { %v293_v42 = vpop.xlane.xlu0 %292 }
 0x255   :  { %v302_v43 = vadd.f32 %v301_v41, %v293_v42 }
 0x257   :  { %v310_v47 = vadd.f32 %v306_v44, %v302_v43 }
 0x258   :  { %v295_v46 = vpop.xlane.xlu1 %294 }
 0x259   :  { %v303_v48 = vadd.f32 %v301_v41, %v295_v46  ;;  %v315_v49 = vsel %vm314_vm1, %v310_v47, -inf }
 0x25b   :  { %v311_v4 = vadd.f32 %v307_v45, %v303_v48 }
 0x25d   :  { %v316_v50 = vsel %vm314_vm1, %v311_v4, -inf }
 0x25e   :  { %v317_v51 = vmax.f32 %v315_v49, %v316_v50  ;;  %v297_v53 = vpop.xlane.xlu0 %296 }
 0x25f   :  { %v304_v54 = vadd.f32 %v301_v41, %v297_v53 }
 0x260   :  { %v318_v55 = vrot.slane %v317_v51, 4  ;;  %v299_v57 = vpop.xlane.xlu1 %298 }
 0x261   :  { %v312_v58 = vadd.f32 %v308_v52, %v304_v54  ;;  %v305_v59 = vadd.f32 %v301_v41, %v299_v57 }
 0x262   :  { %v319_v60 = vmax.f32 %v317_v51, %v318_v55 }
 0x263   :  { %v313_v61 = vadd.f32 %v309_v56, %v305_v59  ;;  %v324_v63 = vsel %vm314_vm1, %v312_v58, -inf }
 0x264   :  { %v320_v62 = vrot.slane %v319_v60, 2 }
 0x265   :  { %v325_v0 = vsel %vm314_vm1, %v313_v61, -inf }
 0x266   :  { %v321_v1 = vmax.f32 %v319_v60, %v320_v62  ;;  %v326_v2 = vmax.f32 %v324_v63, %v325_v0 }
 0x268   :  { %v322_v3 = vrot.slane %v321_v1, 1  ;;  %v327_v5 = vrot.slane %v326_v2, 4 }
 0x26a   :  { %v323_v6 = vmax.f32 %v321_v1, %v322_v3  ;;  %v328_v7 = vmax.f32 %v326_v2, %v327_v5 }
 0x26c   :  { %v333_v8 = vsub.f32 %v310_v47, %v323_v6  ;;  %v334_v10 = vsub.f32 %v311_v4, %v323_v6  ;;  %v329_v11 = vrot.slane %v328_v7, 2 }
 0x26e   :  { %v337_v12 = vmul.f32 1.442695, %v333_v8  ;;  %v339_v13 = vmul.f32 1.442695, %v334_v10  ;;  %v330_v14 = vmax.f32 %v328_v7, %v329_v11 }
 0x270   :  { %606 = vpow2.f32 %v337_v12  ;;  %v331_v15 = vrot.slane %v330_v14, 1 }
 0x271   :  { %608 = vpow2.f32 %v339_v13 }
 0x272   :  { %v332_v16 = vmax.f32 %v330_v14, %v331_v15 }
 0x274   :  { %v335_v17 = vsub.f32 %v312_v58, %v332_v16  ;;  %v336_v18 = vsub.f32 %v313_v61, %v332_v16 }
 0x276   :  { %v341_v21 = vmul.f32 1.442695, %v335_v17  ;;  %v343_v22 = vmul.f32 1.442695, %v336_v18 }
 0x278   :  { %610 = vpow2.f32 %v341_v21 }
 0x279   :  { %612 = vpow2.f32 %v343_v22 }
 0x27a   :  { %v607_v19 = vpop.eup %606 }
 0x27b   :  { %v609_v23 = vpop.eup %608  ;;  %v345_v20 = vsel %vm314_vm1, %v607_v19, 0.0 }
 0x27c   :  { %v346_v24 = vsel %vm314_vm1, %v609_v23, 0.0 }
 0x27d   :  { %v347_v25 = vadd.f32 %v346_v24, %v345_v20 }
 0x27f   :  { %v348_v26 = vrot.slane %v347_v25, 4 }
 0x281   :  { %v349_v27 = vadd.f32 %v348_v26, %v347_v25 }
 0x282   :  { %v611_v28 = vpop.eup %610 }
 0x283   :  { %v613_v29 = vpop.eup %612  ;;  %v354_v30 = vsel %vm314_vm1, %v611_v28, 0.0  ;;  %v350_v31 = vrot.slane %v349_v27, 2 }
 0x284   :  { %v355_v32 = vsel %vm314_vm1, %v613_v29, 0.0 }
 0x285   :  { %v356_v33 = vadd.f32 %v355_v32, %v354_v30  ;;  %v351_v34 = vadd.f32 %v350_v31, %v349_v27 }
 0x287   :  { %v357_v35 = vrot.slane %v356_v33, 4  ;;  %v352_v36 = vrot.slane %v351_v34, 1 }
 0x289   :  { %v353_v37 = vadd.f32 %v352_v36, %v351_v34  ;;  %v358_v38 = vadd.f32 %v357_v35, %v356_v33 }
 0x28b   :  { %614 = vrcp.f32 %v353_v37  ;;  %v359_v39 = vrot.slane %v358_v38, 2 }
 0x28d   :  { %v360_v41 = vadd.f32 %v359_v39, %v358_v38 }
 0x28f   :  { %v361_v42 = vrot.slane %v360_v41, 1 }
 0x291   :  { %v362_v43 = vadd.f32 %v361_v42, %v360_v41 }
 0x293   :  { %616 = vrcp.f32 %v362_v43 }
 0x295   :  { %v615_v44 = vpop.eup %614 }
 0x296   :  { %v365_v45 = vmul.f32 %v615_v44, %v607_v19  ;;  %v366_v46 = vmul.f32 %v615_v44, %v609_v23 }
 0x298   :  { %v369_v47 = vpack.c.bf16 %v366_v46, %v365_v45 }
 0x29a   :  { %371 = vxpose.xlu0.c.b16.start.end [1/1] (short) (narrow) %v369_v47, 16 }
 0x29d   :  { %v617_v48 = vpop.eup %616 }
 0x29e   :  { %v367_v4 = vmul.f32 %v617_v48, %v611_v28  ;;  %v368_v49 = vmul.f32 %v617_v48, %v613_v29 }
 0x2a0   :  { %v370_v50 = vpack.c.bf16 %v368_v49, %v367_v4 }
 0x2a2   :  { %431 = vxpose.xlu1.c.b16.start.end [1/1] (short) (narrow) %v370_v50, 16 }
 0x300   :  { %v379_v51 = vpop.trf.xlu0 }
 0x301   :  { %562 = vmatmul.mubr.msk.bf16.vlgmr.msra.gmra.mrb[0].mxu1 %vm387_vm2, %v379_v51 }
 0x302   :  { %566 = vmatpush3.bf16.msra.mxu1 %v740_v9  ;;  %567 = vmatprep.mubr.msk.bf16.mxu1 %vm670_vm0, %v669_v40 }
 0x308   :  { %v439_v52 = vpop.trf.xlu1 }
 0x309   :  { %568 = vmatmul.mubr.msk.bf16.vlgmr.msra.gmra.mrb[4].mxu1 %vm387_vm2, %v439_v52 }
 0x3d4   :  { %v425_v53 = vpop.f32.mrb[0].mxu1 }
 0x3d5   :  { %490 = vst [vmem:[#allocation6] sm:$0x1] %v425_v53  ;;  %v563_v54 = vpop.f32.mrb[1].mxu1 }
 0x3d6   :  { %v428_v55 = vpop.f32.mrb[2].mxu1 }
 0x3d7   :  { %v564_v56 = vpop.f32.mrb[3].mxu1 }
 0x3dc   :  { %v484_v57 = vpop.f32.mrb[4].mxu1 }
 0x3dd   :  { %491 = vst [vmem:[#allocation6 + $0x1] sm:$0x1] %v484_v57  ;;  %v569_v58 = vpop.f32.mrb[5].mxu1 }
 0x3de   :  { %v487_v59 = vpop.f32.mrb[6].mxu1 }
 0x3df   :  { %651 = shalt.err (!%p648_p12)
}
 0x3e0   :  { %s652_s16 = scalar_lea.hbm %s818_s8, 32 }
 0x3e1   :  { %p653_p13 = scmp.ne.s32.totalorder %s818_s8, %s652_s16  ;;  %p656_p0 = scmp.lt.u32.totalorder %s652_s16, %s818_s8 }
 0x3e3   :  { %p658_p1 = pnand %p656_p0, %p653_p13 }
 0x3e5   :  { %661 = shalt.err (!%p658_p1)
}
 0x3e6   :  { %s672_s2 = smov 16   ;;  %s673_s21 = smov 1   ;;  %v570_v9 = vpop.f32.mrb[7].mxu1 }
 0x3e7   :  { %503 = dma.vmem_to_hbm [thread:$0]  %s498_s12, 32, %s818_s8, [#allocation5], %s672_s2, %s672_s2, %s673_s21  }
 0x3e8   :  { %664 = dma.done.wait [#allocation5], 32  }
 0x3e9   :  { %665 = vsyncadd [#allocation5], 4294967264 }
 0x3ea   :  { %507 = vsyncpa [#allocation4], 1 }
 0x3eb   :  { %508 = vsyncpa [#allocation5], 1 }

</bundles_post_ra>
